<compile_context>
chip_gen: v7x
topology: tpu7x:2x2x1
jax: 0.10.0
libtpu: 0.0.40
codegen_flags: <defaults>
</compile_context>

<pallas_src>
import jax
import jax.numpy as jnp
from jax.experimental import pallas as pl
from jax.experimental.pallas import tpu as pltpu


def _round_up(n: int, m: int) -> int:
    return (n + m - 1) // m * m


def _cdiv(a: int, b: int) -> int:
    return (a + b - 1) // b


def _pad2(a, rows, cols):
    return jnp.pad(a, ((0, rows - a.shape[0]), (0, cols - a.shape[1])))


def one_modality_kernel(x_ref, w1_ref, b1_ref, w2_ref, b2_ref,
                        wfc_ref, bfc_ref, pred_ref):
    """encoder (Linear -> ReLU -> Linear) + fc head, fused in one kernel."""
    # Cast x to the weight dtype in-kernel (no wrapper HBM round trip; no-op if
    # the caller already holds param_dtype).  All matmuls hit the MXU with f32
    # accumulation; bias-add / ReLU stay f32 (v5e has no bf16 VALU path).
    x = x_ref[...].astype(w1_ref.dtype)
    h = jnp.dot(x, w1_ref[...],
                preferred_element_type=jnp.float32) + b1_ref[...]
    h = jnp.maximum(h, 0.0)
    z = jnp.dot(h.astype(w2_ref.dtype), w2_ref[...],
                preferred_element_type=jnp.float32) + b2_ref[...]
    pred = jnp.dot(z.astype(wfc_ref.dtype), wfc_ref[...],
                   preferred_element_type=jnp.float32) + bfc_ref[...]
    pred_ref[...] = pred.astype(pred_ref.dtype)


def one_modality_forward(x, w1, b1, w2, b2, wfc, bfc, *,
                         bm=1024, param_dtype=jnp.bfloat16, out_dtype=None):
    """Pallas forward for OneModality.

    Weights are (in_features, out_features); biases are (1, out_features).
    Only the weight-output / lane dims (hidden, dim, n_class) are zero-padded
    to multiples of 128; x and the contraction dim are fed unpadded and the
    batch is tiled with a (possibly ragged) cdiv grid.  The result is sliced
    back to (B, n_class).
    """
    B, n_in = x.shape
    hidden = w1.shape[1]
    dim = w2.shape[1]
    n_class = wfc.shape[1]
    if out_dtype is None:
        out_dtype = param_dtype

    # ---- lane/output dims -> x128 (lane-dense stores, full MXU columns) ----
    hid_p = _round_up(hidden, 128)
    dim_p = _round_up(dim, 128)
    ncls_p = _round_up(n_class, 128)

    # Weights/biases are tiny vs. x and fetched once (constant index_maps), so
    # the one-time pad/cast here is negligible.  Biases stay f32 (f32 epilogue).
    w1p = _pad2(w1, n_in, hid_p).astype(param_dtype)
    w2p = _pad2(w2, hid_p, dim_p).astype(param_dtype)
    wfcp = _pad2(wfc, dim_p, ncls_p).astype(param_dtype)
    b1p = _pad2(b1, 1, hid_p).astype(jnp.float32)
    b2p = _pad2(b2, 1, dim_p).astype(jnp.float32)
    bfcp = _pad2(bfc, 1, ncls_p).astype(jnp.float32)

    # ---- batch tiling: balanced cdiv grid, no batch padding of x -----------
    #  * >= 2 tiles whenever B >= 16 so v7x's two TensorCores both get work.
    #  * tiles never exceed the array (ragged LAST block only; its garbage
    #    rows are masked on store and never reach the [:B] slice).
    if B < 8:
        bm_eff, n_tiles = B, 1            # block rows == full dim (legal)
    else:
        bm_cap = min(bm, _round_up(_cdiv(B, 2), 8)) if B >= 16 else bm
        n_tiles = max(1, _cdiv(B, max(8, bm_cap)))
        bm_eff = max(8, _round_up(_cdiv(B, n_tiles), 8))
        if bm_eff > B:                    # never let a block overrun the array
            bm_eff = (B // 8) * 8
        n_tiles = _cdiv(B, bm_eff)

    in_specs = [
        pl.BlockSpec((bm_eff, n_in), lambda i: (i, 0)),   # x tile (streamed)
        pl.BlockSpec((n_in, hid_p), lambda i: (0, 0)),    # W1 (VMEM-resident)
        pl.BlockSpec((1, hid_p), lambda i: (0, 0)),       # b1
        pl.BlockSpec((hid_p, dim_p), lambda i: (0, 0)),   # W2 (VMEM-resident)
        pl.BlockSpec((1, dim_p), lambda i: (0, 0)),       # b2
        pl.BlockSpec((dim_p, ncls_p), lambda i: (0, 0)),  # Wfc (VMEM-resident)
        pl.BlockSpec((1, ncls_p), lambda i: (0, 0)),      # bfc
    ]
    out_specs = pl.BlockSpec((bm_eff, ncls_p), lambda i: (i, 0))

    pred = pl.pallas_call(
        one_modality_kernel,
        out_shape=jax.ShapeDtypeStruct((B, ncls_p), out_dtype),
        grid=(n_tiles,),
        in_specs=in_specs,
        out_specs=out_specs,
        compiler_params=pltpu.CompilerParams(
            dimension_semantics=("parallel",),
            vmem_limit_bytes=32 * 1024 * 1024),
    )(x, w1p, b1p, w2p, b2p, wfcp, bfcp)

    return pred[:B, :n_class]


if __name__ == "__main__":
    # Small shapes consistent with the module: flattened features -> dim -> n_class
    B, n_inputs, hidden, dim, n_class = 16, 64, 128, 64, 10

    key = jax.random.PRNGKey(0)
    kx, k1, k2, k3, k4, k5, k6 = jax.random.split(key, 7)

    x = jax.random.normal(kx, (B, n_inputs), jnp.float32)

    # Deterministic parameter init (weights stored (in, out); PyTorch-style scale)
    w1 = jax.random.normal(k1, (n_inputs, hidden), jnp.float32) * (1.0 / n_inputs ** 0.5)
    b1 = jax.random.normal(k2, (1, hidden), jnp.float32) * 0.01
    w2 = jax.random.normal(k3, (hidden, dim), jnp.float32) * (1.0 / hidden ** 0.5)
    b2 = jax.random.normal(k4, (1, dim), jnp.float32) * 0.01
    wfc = jax.random.normal(k5, (dim, n_class), jnp.float32) * (1.0 / dim ** 0.5)
    bfc = jax.random.normal(k6, (1, n_class), jnp.float32) * 0.01

    # ---- bf16 fast path (default: bf16 weights, bf16 output, f32 accum) -----
    pred_bf16 = jax.block_until_ready(
        one_modality_forward(x, w1, b1, w2, b2, wfc, bfc))
    assert pred_bf16.shape == (B, n_class)
    assert pred_bf16.dtype == jnp.bfloat16

    # Reference at matching precision (bf16 params, f32 accumulation, bf16 out).
    pd = jnp.bfloat16
    h_r = jnp.maximum(jnp.dot(x.astype(pd), w1.astype(pd),
                              preferred_element_type=jnp.float32) + b1, 0.0)
    z_r = jnp.dot(h_r.astype(pd), w2.astype(pd),
                  preferred_element_type=jnp.float32) + b2
    p_r = (jnp.dot(z_r.astype(pd), wfc.astype(pd),
                   preferred_element_type=jnp.float32) + bfc).astype(pd)
    assert jnp.allclose(pred_bf16.astype(jnp.float32), p_r.astype(jnp.float32),
                        atol=2e-2, rtol=2e-2)

    # ---- exact f32 path vs. the original module math ------------------------
    pred_f32 = jax.block_until_ready(
        one_modality_forward(x, w1, b1, w2, b2, wfc, bfc,
                             param_dtype=jnp.float32, out_dtype=jnp.float32))
    h_ref = jnp.maximum(x @ w1 + b1, 0.0)
    pred_ref = (h_ref @ w2 + b2) @ wfc + bfc
    assert jnp.allclose(pred_f32, pred_ref, atol=1e-4, rtol=1e-4)

    print("KERNEL_OK")
</pallas_src>

<mosaic_0001>
module attributes {stable_mosaic.version = 11 : i64} {
  func.func @one_modality_kernel(%arg0: i32, %arg1: memref<8x64xf32, #tpu.memory_space<vmem>>, %arg2: memref<64x128xbf16, #tpu.memory_space<vmem>>, %arg3: memref<1x128xf32, #tpu.memory_space<vmem>>, %arg4: memref<128x128xbf16, #tpu.memory_space<vmem>>, %arg5: memref<1x128xf32, #tpu.memory_space<vmem>>, %arg6: memref<128x128xbf16, #tpu.memory_space<vmem>>, %arg7: memref<1x128xf32, #tpu.memory_space<vmem>>, %arg8: memref<8x128xbf16, #tpu.memory_space<vmem>>) attributes {dimension_semantics = [#tpu.dimension_semantics<parallel>], iteration_bounds = array<i64: 2>, scalar_prefetch = 0 : i64, scratch_operands = 0 : i64, tpu.core_type = #tpu.core_type<tc>, window_params = [{transform_indices = @transform_0, window_bounds = array<i64: 8, 64>}, {pipeline_mode = #tpu.pipeline_mode<synchronous>, transform_indices = @transform_1, window_bounds = array<i64: 64, 128>}, {pipeline_mode = #tpu.pipeline_mode<synchronous>, transform_indices = @transform_2, window_bounds = array<i64: 1, 128>}, {pipeline_mode = #tpu.pipeline_mode<synchronous>, transform_indices = @transform_3, window_bounds = array<i64: 128, 128>}, {pipeline_mode = #tpu.pipeline_mode<synchronous>, transform_indices = @transform_4, window_bounds = array<i64: 1, 128>}, {pipeline_mode = #tpu.pipeline_mode<synchronous>, transform_indices = @transform_5, window_bounds = array<i64: 128, 128>}, {pipeline_mode = #tpu.pipeline_mode<synchronous>, transform_indices = @transform_6, window_bounds = array<i64: 1, 128>}, {transform_indices = @transform_7, window_bounds = array<i64: 8, 128>}]} {
    %c0 = arith.constant 0 : index
    %c0_0 = arith.constant 0 : index
    %0 = vector.load %arg1[%c0, %c0_0] : memref<8x64xf32, #tpu.memory_space<vmem>>, vector<8x64xf32>
    %1 = arith.truncf %0 : vector<8x64xf32> to vector<8x64xbf16>
    %c0_1 = arith.constant 0 : index
    %c0_2 = arith.constant 0 : index
    %2 = vector.load %arg2[%c0_1, %c0_2] : memref<64x128xbf16, #tpu.memory_space<vmem>>, vector<64x128xbf16>
    %cst = arith.constant dense<0.000000e+00> : vector<8x128xf32>
    %3 = tpu.matmul %1, %2, %cst {dimension_numbers = #tpu.dot_dimension_numbers<[1], [0], [0], [1], [0, 0, 1, 1], [], []>} : vector<8x64xbf16>, vector<64x128xbf16>, vector<8x128xf32> -> vector<8x128xf32>
    %c0_3 = arith.constant 0 : index
    %c0_4 = arith.constant 0 : index
    %4 = vector.load %arg3[%c0_3, %c0_4] : memref<1x128xf32, #tpu.memory_space<vmem>>, vector<1x128xf32>
    %5 = vector.broadcast %4 : vector<1x128xf32> to vector<8x128xf32>
    %6 = arith.addf %3, %5 : vector<8x128xf32>
    %cst_5 = arith.constant 0.000000e+00 : f32
    %7 = vector.broadcast %cst_5 : f32 to vector<8x128xf32>
    %8 = arith.maximumf %6, %7 : vector<8x128xf32>
    %9 = arith.truncf %8 : vector<8x128xf32> to vector<8x128xbf16>
    %c0_6 = arith.constant 0 : index
    %c0_7 = arith.constant 0 : index
    %10 = vector.load %arg4[%c0_6, %c0_7] : memref<128x128xbf16, #tpu.memory_space<vmem>>, vector<128x128xbf16>
    %cst_8 = arith.constant dense<0.000000e+00> : vector<8x128xf32>
    %11 = tpu.matmul %9, %10, %cst_8 {dimension_numbers = #tpu.dot_dimension_numbers<[1], [0], [0], [1], [0, 0, 1, 1], [], []>} : vector<8x128xbf16>, vector<128x128xbf16>, vector<8x128xf32> -> vector<8x128xf32>
    %c0_9 = arith.constant 0 : index
    %c0_10 = arith.constant 0 : index
    %12 = vector.load %arg5[%c0_9, %c0_10] : memref<1x128xf32, #tpu.memory_space<vmem>>, vector<1x128xf32>
    %13 = vector.broadcast %12 : vector<1x128xf32> to vector<8x128xf32>
    %14 = arith.addf %11, %13 : vector<8x128xf32>
    %15 = arith.truncf %14 : vector<8x128xf32> to vector<8x128xbf16>
    %c0_11 = arith.constant 0 : index
    %c0_12 = arith.constant 0 : index
    %16 = vector.load %arg6[%c0_11, %c0_12] : memref<128x128xbf16, #tpu.memory_space<vmem>>, vector<128x128xbf16>
    %cst_13 = arith.constant dense<0.000000e+00> : vector<8x128xf32>
    %17 = tpu.matmul %15, %16, %cst_13 {dimension_numbers = #tpu.dot_dimension_numbers<[1], [0], [0], [1], [0, 0, 1, 1], [], []>} : vector<8x128xbf16>, vector<128x128xbf16>, vector<8x128xf32> -> vector<8x128xf32>
    %c0_14 = arith.constant 0 : index
    %c0_15 = arith.constant 0 : index
    %18 = vector.load %arg7[%c0_14, %c0_15] : memref<1x128xf32, #tpu.memory_space<vmem>>, vector<1x128xf32>
    %19 = vector.broadcast %18 : vector<1x128xf32> to vector<8x128xf32>
    %20 = arith.addf %17, %19 : vector<8x128xf32>
    %21 = arith.truncf %20 : vector<8x128xf32> to vector<8x128xbf16>
    %c0_16 = arith.constant 0 : index
    %c0_17 = arith.constant 0 : index
    %22 = vector.load %arg8[%c0_16, %c0_17] : memref<8x128xbf16, #tpu.memory_space<vmem>>, vector<8x128xbf16>
    tpu.vector_store %arg8[%c0_16, %c0_17], %21 {strides = array<i32>} : memref<8x128xbf16, #tpu.memory_space<vmem>>, vector<8x128xbf16>,
    return
  }
  func.func @transform_0(%arg0: i32) -> (i32, i32) {
    %c0_i32 = arith.constant 0 : i32
    %c0_i32_0 = arith.constant 0 : i32
    return %arg0, %c0_i32 : i32, i32
  }
  func.func @transform_1(%arg0: i32) -> (i32, i32) {
    %c0_i32 = arith.constant 0 : i32
    %c0_i32_0 = arith.constant 0 : i32
    %c0_i32_1 = arith.constant 0 : i32
    return %c0_i32, %c0_i32_0 : i32, i32
  }
  func.func @transform_2(%arg0: i32) -> (i32, i32) {
    %c0_i32 = arith.constant 0 : i32
    %c0_i32_0 = arith.constant 0 : i32
    %c0_i32_1 = arith.constant 0 : i32
    return %c0_i32, %c0_i32_0 : i32, i32
  }
  func.func @transform_3(%arg0: i32) -> (i32, i32) {
    %c0_i32 = arith.constant 0 : i32
    %c0_i32_0 = arith.constant 0 : i32
    %c0_i32_1 = arith.constant 0 : i32
    return %c0_i32, %c0_i32_0 : i32, i32
  }
  func.func @transform_4(%arg0: i32) -> (i32, i32) {
    %c0_i32 = arith.constant 0 : i32
    %c0_i32_0 = arith.constant 0 : i32
    %c0_i32_1 = arith.constant 0 : i32
    return %c0_i32, %c0_i32_0 : i32, i32
  }
  func.func @transform_5(%arg0: i32) -> (i32, i32) {
    %c0_i32 = arith.constant 0 : i32
    %c0_i32_0 = arith.constant 0 : i32
    %c0_i32_1 = arith.constant 0 : i32
    return %c0_i32, %c0_i32_0 : i32, i32
  }
  func.func @transform_6(%arg0: i32) -> (i32, i32) {
    %c0_i32 = arith.constant 0 : i32
    %c0_i32_0 = arith.constant 0 : i32
    %c0_i32_1 = arith.constant 0 : i32
    return %c0_i32, %c0_i32_0 : i32, i32
  }
  func.func @transform_7(%arg0: i32) -> (i32, i32) {
    %c0_i32 = arith.constant 0 : i32
    %c0_i32_0 = arith.constant 0 : i32
    return %arg0, %c0_i32 : i32, i32
  }
}

</mosaic_0001>

<bundles_post_ra>
// kernel: tpu_custom_call.1
= control target key start
LH: loop header
LB: loop body
LE: loop exit
PB: predicated region body
PF: predicated region fallthrough
CT: control target
= control target key end

     0   :  { %12 = vsyncpa [#allocation3], 0  ;;  %s1520_s0 = inlined_call_operand.hbm [shape: f32[16,64], index: 0, kind: input, shape index: {}]   ;;  %s1521_s1 = inlined_call_operand.hbm [shape: bf16[64,128], index: 1, kind: input, shape index: {}]   ;;  %s1522_s2 = inlined_call_operand.vmem [shape: f32[1,128], index: 2, kind: input, shape index: {}]   ;;  %s1523_s3 = inlined_call_operand.hbm [shape: bf16[128,128], index: 3, kind: input, shape index: {}]   ;;  %s1524_s4 = inlined_call_operand.vmem [shape: f32[1,128], index: 4, kind: input, shape index: {}]   ;;  %s1525_s5 = inlined_call_operand.hbm [shape: bf16[128,128], index: 5, kind: input, shape index: {}]   ;;  %s1526_s6 = inlined_call_operand.vmem [shape: f32[1,128], index: 6, kind: input, shape index: {}]   ;;  %s1527_s7 = inlined_call_operand.hbm [shape: bf16[16,128], index: 7, kind: output, shape index: {}]  }
   0x1   :  { %14 = vsyncpa [#allocation3 + $0x1], 0 }
   0x2   :  { %15 = vsyncpa [#allocation6], 0 }
   0x3   :  { %16 = vsyncpa [#allocation9], 0 }
   0x4   :  { %17 = vsyncpa [#allocation4], 0 }
   0x5   :  { %19 = vsyncpa [#allocation4 + $0x1], 0  ;;  %s1221_s24 = smov 0   ;;  %s1223_s25 = smov 0  }
   0x6   :  { %s1225_s26 = smov 0   ;;  %s1227_s27 = smov 0  }
   0x7 LB: > { %s1242_s28 = sadd.s32 4294967295, %s1170_s27   ;;  %s764_s29 = sadd.s32 4294967294, %s1170_s27   ;;  %s1170_s27 = sphi %s1227_s27, %s1553_s27   ;;  %s1166_s26 = sphi %s1225_s26, %s1552_s26   ;;  %s1162_s25 = sphi %s1223_s25, %s1551_s25   ;;  %s1158_s24 = sphi %s1221_s24, %s1550_s24  }
   0x8   : > { %p45_p0 = scmp.ne.s32.totalorder %s1162_s25, %s1158_s24  ;;  %p1528_p1 = scmp.eq.s32.totalorder %s1242_s28, 0 }
   0x9   : > { %p201_p3 = scmp.eq.s32.totalorder %s764_s29, 1  ;;  %p765_p5 = scmp.ge.s32.totalorder %s1170_s27, 1 }
   0xa   : > { %p1251_p4 = por %p1528_p1, %p45_p0  ;;  %p208_p7 = scmp.lt.s32.totalorder %s1170_s27, 3 }
   0xb   : > { %p1256_p6 = por %p201_p3, %p45_p0  ;;  %s1172_s10 = smov [#allocation5]  }
   0xc   : > { %s1532_s30 = scalar_select %p1251_p4, 1, 0 }
   0xd   : > { %s1533_s8 = scalar_select %p1256_p6, 1, 0 }
   0xe   : > { %p1261_p8 = pnand %p765_p5, %p208_p7  ;;  %s220_s11 = sshll.u32 %s1172_s10, 4  ;;  %s1265_s11 = int_to_ptr.vmem [resolvable:$true] %s220_s11 }
   0xf   : > { %1534 = sst [smem:[#allocation15_spill]] %s1533_s8  ;;  %s1173_s13 = smov [#allocation7]  }
  0x10   : > { %s1535_s9 = scalar_select %p1261_p8, 1, 0 }
  0x11   : > { %p897_p9 = pneg %p1261_p8  ;;  %s236_s14 = sshll.u32 %s1173_s13, 4  ;;  %s1276_s14 = int_to_ptr.vmem [resolvable:$true] %s236_s14 }
  0x12   : > { %s1174_s15 = smov [#allocation8]   ;;  %s982_s19 = scalar_lea.hbm %s1521_s1, 512 }
  0x13   : > { %p1272_p11 = pnand %p897_p9, %p1528_p1  ;;  %s1278_s16 = sshll.u32 %s1174_s15, 4  ;;  %s253_s16 = int_to_ptr.vmem [resolvable:$true] %s1278_s16 }
  0x14   : > { %p983_p12 = scmp.ne.s32.totalorder %s1521_s1, %s982_s19  ;;  %p989_p5 = scmp.lt.u32.totalorder %s982_s19, %s1521_s1 }
  0x15   : > { %p1288_p13 = pneg %p1272_p11 }
  0x17   : > { %p985_p0 = pnand %p1288_p13, %p983_p12 }
  0x19   : > { %p986_p3 = pneg %p985_p0 }
  0x1b   : > { %p991_p7 = pnand %p989_p5, %p986_p3 }
  0x1d   : > { %994 = shalt.err (!%p991_p7)
}
  0x1e   : > { %s995_s10 = scalar_lea.vmem %s1265_s11, 512  ;;  %p1003_p2 = scmp.lt.s32.totalorder %s1265_s11, %s1265_s11 }
  0x1f   : > { %p996_p9 = scmp.ne.s32.totalorder %s1265_s11, %s995_s10  ;;  %p1004_p6 = scmp.lt.s32.totalorder %s995_s10, %s995_s10 }
  0x21   : > { %p998_p10 = pnand %p996_p9, %p1288_p13  ;;  %p1005_p12 = por %p1004_p6, %p1003_p2 }
  0x23   : > { %p999_p1 = pneg %p998_p10 }
  0x25   : > { %p1006_p0 = pnand %p1005_p12, %p999_p1 }
  0x27   : > { %1009 = shalt.err (!%p1006_p0)
}
  0x28   : > { %s1175_s13 = smov 64   ;;  %s1176_s15 = smov 4  }
  0x29   : > { %900 = dma.hbm_to_vmem [thread:$0]  (!%p1272_p11), %s1521_s1, 512, %s1265_s11, [#allocation6], %s1175_s13, %s1175_s13, %s1176_s15  }
  0x2a   : > { %s1010_s21 = scalar_lea.hbm %s1523_s3, 1024 }
  0x2b   : > { %p1011_p1 = scmp.ne.s32.totalorder %s1523_s3, %s1010_s21  ;;  %p1017_p10 = scmp.lt.u32.totalorder %s1010_s21, %s1523_s3 }
  0x2d   : > { %p1013_p2 = pnand %p1011_p1, %p1288_p13 }
  0x2f   : > { %p1014_p6 = pneg %p1013_p2 }
  0x31   : > { %p1019_p3 = pnand %p1017_p10, %p1014_p6 }
  0x33   : > { %1022 = shalt.err (!%p1019_p3)
}
  0x34   : > { %s1023_s11 = scalar_lea.vmem %s1276_s14, 1024  ;;  %p1031_p12 = scmp.lt.s32.totalorder %s1276_s14, %s1276_s14 }
  0x35   : > { %p1024_p5 = scmp.ne.s32.totalorder %s1276_s14, %s1023_s11  ;;  %p1032_p0 = scmp.lt.s32.totalorder %s1023_s11, %s1023_s11 }
  0x37   : > { %p1026_p7 = pnand %p1024_p5, %p1288_p13  ;;  %p1033_p1 = por %p1032_p0, %p1031_p12 }
  0x39   : > { %p1027_p9 = pneg %p1026_p7 }
  0x3b   : > { %p1034_p2 = pnand %p1033_p1, %p1027_p9 }
  0x3d   : > { %1037 = shalt.err (!%p1034_p2)
}
  0x3e   : > { %903 = dma.hbm_to_vmem [thread:$0]  (!%p1272_p11), %s1523_s3, 1024, %s1276_s14, [#allocation6], %s1175_s13, %s1175_s13, %s1176_s15  }
  0x3f   : > { %s1038_s20 = scalar_lea.hbm %s1525_s5, 1024 }
  0x40   : > { %p1039_p6 = scmp.ne.s32.totalorder %s1525_s5, %s1038_s20  ;;  %p1045_p5 = scmp.lt.u32.totalorder %s1038_s20, %s1525_s5 }
  0x42   : > { %p1041_p10 = pnand %p1039_p6, %p1288_p13 }
  0x44   : > { %p1042_p3 = pneg %p1041_p10 }
  0x46   : > { %p1047_p7 = pnand %p1045_p5, %p1042_p3 }
  0x48   : > { %1050 = shalt.err (!%p1047_p7)
}
  0x49   : > { %s1051_s11 = scalar_lea.vmem %s253_s16, 1024  ;;  %p1059_p1 = scmp.lt.s32.totalorder %s253_s16, %s253_s16 }
  0x4a   : > { %p1052_p9 = scmp.ne.s32.totalorder %s253_s16, %s1051_s11  ;;  %p1060_p2 = scmp.lt.s32.totalorder %s1051_s11, %s1051_s11 }
  0x4c   : > { %p1054_p12 = pnand %p1052_p9, %p1288_p13  ;;  %p1061_p4 = por %p1060_p2, %p1059_p1 }
  0x4e   : > { %p1055_p0 = pneg %p1054_p12 }
  0x50   : > { %p1062_p8 = pnand %p1061_p4, %p1055_p0 }
  0x52   : > { %1065 = shalt.err (!%p1062_p8)
}
  0x53   : > { %906 = dma.hbm_to_vmem [thread:$0]  (!%p1272_p11), %s1525_s5, 1024, %s253_s16, [#allocation9], %s1175_s13, %s1175_s13, %s1176_s15  }
  0x54   : > { %s1361_s22 = sadd.s32 1, %s1170_s27   ;;  %s32_s17 = sadd.s32 1, %s1166_s26 }
  0x55   : > { %s29_s12 = ssub.s32 %s1170_s27, %s1361_s22  ;;  %p39_p8 = scmp.ne.s32.totalorder %s1166_s26, %s1162_s25 }
  0x56   : > { %p30_p4 = scmp.eq.s32.totalorder %s29_s12, 0  ;;  %p40_p13 = scmp.eq.s32.totalorder %s1170_s27, 0 }
  0x57   : > { %p918_p6 = scmp.lt.s32.totalorder %s1170_s27, 2  ;;  %p1538_p3 = scmp.eq.s32.totalorder %s1242_s28, 1 }
  0x58   : > { %s1371_s18 = scalar_select %p30_p4, %s1166_s26, %s32_s17  }
  0x59   : > { %p41_p10 = por %p40_p13, %p39_p8  ;;  %p1375_p5 = por %p1538_p3, %p39_p8 }
  0x5a   : > { %s269_s20 = sand.u32 1, %s1166_s26   ;;  %s771_s21 = sshll.u32 %s1170_s27, 7 }
  0x5b   : > { %s770_s16 = sshll.u32 %s269_s20, 3  ;;  %s1384_s23 = scalar_lea.hbm %s1520_s0, %s771_s21 }
  0x5c   : > { %s273_s29 = scalar_lea.vmem [#allocation2], %s770_s16  ;;  %p1386_p11 = pnand %p918_p6, %p41_p10 }
  0x5d   : > { %s280_s10 = sshll.u32 %s273_s29, 4  ;;  %s270_s14 = scalar_lea.sflag [#allocation3], %s269_s20  ;;  %s1390_s10 = int_to_ptr.vmem [resolvable:$true] %s280_s10 }
  0x5e   : > { %s1066_s8 = scalar_lea.hbm %s1384_s23, 128  ;;  %p1068_p9 = pneg %p1386_p11 }
  0x5f   : > { %p1067_p7 = scmp.ne.s32.totalorder %s1384_s23, %s1066_s8  ;;  %s1071_s21 = scalar_lea.hbm %s1520_s0, 256 }
  0x60   : > { %p1072_p1 = scmp.lt.u32.totalorder %s1384_s23, %s1520_s0  ;;  %p1073_p2 = scmp.lt.u32.totalorder %s1071_s21, %s1066_s8 }
  0x61   : > { %p1069_p12 = pnand %p1068_p9, %p1067_p7  ;;  %p1075_p8 = scmp.lt.u32.totalorder %s1066_s8, %s1384_s23 }
  0x62   : > { %p1074_p4 = por %p1073_p2, %p1072_p1 }
  0x63   : > { %p1070_p0 = pneg %p1069_p12 }
  0x64   : > { %p1076_p13 = por %p1075_p8, %p1074_p4 }
  0x66   : > { %p1077_p6 = pnand %p1076_p13, %p1070_p0 }
  0x68   : > { %1080 = shalt.err (!%p1077_p6)
}
  0x69   : > { %s1081_s20 = scalar_lea.vmem %s1390_s10, 128  ;;  %s1177_s15 = smov [#allocation2]  }
  0x6a   : > { %p1082_p10 = scmp.ne.s32.totalorder %s1390_s10, %s1081_s20  ;;  %s1086_s29 = sshll.u32 %s1177_s15, 4  ;;  %s1087_s29 = int_to_ptr.vmem [resolvable:$false] %s1086_s29 }
  0x6b   : > { %s1088_s12 = scalar_lea.vmem %s1087_s29, 256  ;;  %p1089_p12 = scmp.lt.s32.totalorder %s1390_s10, %s1087_s29 }
  0x6c   : > { %p1084_p3 = pnand %p1082_p10, %p1068_p9  ;;  %p1090_p1 = scmp.lt.s32.totalorder %s1088_s12, %s1081_s20 }
  0x6e   : > { %p1085_p7 = pneg %p1084_p3  ;;  %p1091_p2 = por %p1090_p1, %p1089_p12 }
  0x70   : > { %p1092_p4 = pnand %p1091_p2, %p1085_p7 }
  0x72   : > { %1095 = shalt.err (!%p1092_p4)
}
  0x73   : > { %910 = dma.hbm_to_vmem [thread:$0]  (!%p1386_p11), %s1384_s23, 128, %s1390_s10, %s270_s14  }
  0x74   : > { %p1541_p0 = scmp.ne.s32.totalorder %s1535_s9, 0 }
  0x75   : > { %s1420_s8 = sand.u32 (!%p1541_p0), 1, %s1162_s25   ;;  %p1542_p9 = scmp.ne.s32.totalorder (!%p1541_p0), %s1532_s30, 0 }
  0x76   : > { %289 = sbr.rel (%p1541_p0) target bundleno = 814 (0x32e), region = 48  ;;  %s773_s17 = sshll.u32 (!%p1541_p0), %s1420_s8, 3 }
  0x77   : > { %s292_s21 = scalar_lea.sflag (!%p1541_p0), [#allocation3], %s1420_s8  ;;  %s295_s16 = scalar_lea.vmem (!%p1541_p0), [#allocation2], %s773_s17 }
  0x7d   : > { %1141 = dma.done.wait (%p1542_p9), %s292_s21, 128  }
  0x7e   : > { %1143 = vsyncadd (%p1542_p9), %s292_s21, 4294967168  ;;  %p1543_p8 = scmp.eq.s32.totalorder %s1242_s28, 0 }
  0x80   : > { %1145 = dma.done.wait (%p1543_p8), [#allocation6], 1536   ;;  %p1544_p11 = pmov %p1543_p8 }
  0x81   : > { %p1545_p13 = pmov %p1543_p8 }
  0x82   : > { %1147 = vsyncadd (%p1544_p11), [#allocation6], 4294965760 }
  0x83   : > { %1149 = dma.done.wait (%p1545_p13), [#allocation9], 1024   ;;  %p1546_p6 = pmov %p1543_p8 }
  0x84   : > { %v1178_v0 = vmov 0.0   ;;  %vm1179_vm0 = vmmov 0   ;;  %v962_v1 = vld [vmem:[#allocation5] sm:$0xff]   ;;  %v963_v2 = vld [vmem:[#allocation5 + $0x8] sm:$0xff]   ;;  %v964_v4 = vld [vmem:[#allocation5 + $0x10] sm:$0xff]   ;;  %vm380_vm1 = vcmask 523264  }
  0x85   : > { %1151 = vsyncadd (%p1546_p6), [#allocation9], 4294966272  ;;  %829 = vmatprep.subr.bf16.mxu0 %v1178_v0  ;;  %837 = vmatprep.mubr.msk.bf16.mxu0 %vm1179_vm0, %v1178_v0  ;;  %v966_v3 = vld [vmem:[#allocation7] sm:$0xff]   ;;  %v967_v5 = vld [vmem:[#allocation7 + $0x8] sm:$0xff]   ;;  %s777_s11 = sshll.u32 %s1420_s8, 2  ;;  %s803_s20 = sshll.u32 %s1242_s28, 6 }
  0x86   : > { %841 = vmatprep.subr.bf16.mxu1 %v1178_v0  ;;  %857 = vmatprep.mubr.msk.bf16.mxu1 %vm1179_vm0, %v1178_v0  ;;  %v965_v6 = vld [vmem:[#allocation5 + $0x18] sm:$0xff]   ;;  %v968_v8 = vld [vmem:[#allocation7 + $0x10] sm:$0xff]   ;;  %v970_v11 = vld [vmem:[#allocation7 + $0x20] sm:$0xff]   ;;  %s337_s15 = scalar_lea.vmem [#allocation10], %s777_s11  ;;  %s1476_s21 = scalar_lea.hbm %s1527_s7, %s803_s20 }
  0x87   : > { %830 = vmatpush3.bf16.msra.mxu0 %v962_v1  ;;  %842 = vmatpush3.bf16.msra.mxu1 %v966_v3  ;;  %v339_v7 = vld [vmem:[%s295_s16] sm:$0xff]  ;;  %v971_v12 = vld [vmem:[#allocation7 + $0x28] sm:$0xff]   ;;  %v974_v15 = vld [vmem:[#allocation8] sm:$0xff]   ;;  %s665_s29 = sshll.u32 %s337_s15, 4  ;;  %s652_s16 = scalar_lea.sflag [#allocation4], %s1420_s8  ;;  %s1478_s29 = int_to_ptr.vmem [resolvable:$true] %s665_s29 }
  0x88   : > { %831 = vmatprep.subr.bf16.mxu0 %v1178_v0  ;;  %843 = vmatprep.subr.bf16.mxu1 %v1178_v0  ;;  %v340_v9 = vpack.c.bf16 %v339_v7, %v339_v7  ;;  %v969_v10 = vld [vmem:[#allocation7 + $0x18] sm:$0xff]   ;;  %v972_v13 = vld [vmem:[#allocation7 + $0x30] sm:$0xff]   ;;  %v975_v16 = vld [vmem:[#allocation8 + $0x8] sm:$0xff]   ;;  %s1096_s28 = scalar_lea.vmem %s1478_s29, 64  ;;  %s1180_s30 = smov [#allocation10]  }
  0x89   : > { %v973_v14 = vld [vmem:[#allocation7 + $0x38] sm:$0xff]   ;;  %v976_v17 = vld [vmem:[#allocation8 + $0x10] sm:$0xff]   ;;  %v978_v19 = vld [vmem:[#allocation8 + $0x20] sm:$0xff]   ;;  %p1097_p10 = scmp.ne.s32.totalorder %s1478_s29, %s1096_s28  ;;  %s1100_s9 = sshll.u32 %s1180_s30, 4  ;;  %s1101_s9 = int_to_ptr.vmem [resolvable:$false] %s1100_s9 }
  0x8a   : > { %v977_v18 = vld [vmem:[#allocation8 + $0x18] sm:$0xff]   ;;  %v979_v20 = vld [vmem:[#allocation8 + $0x28] sm:$0xff]   ;;  %v980_v21 = vld [vmem:[#allocation8 + $0x30] sm:$0xff]   ;;  %s1102_s23 = scalar_lea.vmem %s1101_s9, 128  ;;  %p1103_p12 = scmp.lt.s32.totalorder %s1478_s29, %s1101_s9 }
  0x8b   : > { %832 = vmatpush3.bf16.msra.mxu0 %v963_v2  ;;  %844 = vmatpush3.bf16.msra.mxu1 %v967_v5  ;;  %v778_v22 = vld [vmem:[%s1522_s2] ss:$0 sm:$0xff]  ;;  %v981_v30 = vld [vmem:[#allocation8 + $0x38] sm:$0xff]   ;;  %p1098_p3 = pnand %p1097_p10, %p1375_p5  ;;  %p1104_p1 = scmp.lt.s32.totalorder %s1102_s23, %s1096_s28 }
  0x8c   : > { %833 = vmatprep.subr.bf16.mxu0 %v1178_v0  ;;  %845 = vmatprep.subr.bf16.mxu1 %v1178_v0  ;;  %v784_v31 = vld [vmem:[%s1524_s4] ss:$0 sm:$0xff] }
  0x8d   : > { %v793_v38 = vld [vmem:[%s1526_s6] ss:$0 sm:$0xff]  ;;  %p1099_p7 = pneg %p1098_p3  ;;  %p1105_p2 = por %p1104_p1, %p1103_p12 }
  0x8f   : > { %834 = vmatpush3.bf16.msra.mxu0 %v964_v4  ;;  %846 = vmatpush3.bf16.msra.mxu1 %v968_v8  ;;  %p1106_p4 = pnand %p1105_p2, %p1099_p7 }
  0x90   : > { %835 = vmatprep.subr.bf16.mxu0 %v1178_v0  ;;  %847 = vmatprep.subr.bf16.mxu1 %v1178_v0 }
  0x93   : > { %836 = vmatpush3.bf16.msra.mxu0 %v965_v6  ;;  %848 = vmatpush3.bf16.msra.mxu1 %v969_v10 }
  0x94   : > { %861 = vmatprep.subr.bf16.mxu0 %v1178_v0  ;;  %849 = vmatprep.subr.bf16.mxu1 %v1178_v0 }
  0x96   : > { %838 = vmatmul.mubr.msk.bf16.vlgmr.msra.gmra.mrb[0].mxu0 %vm380_vm1, %v340_v9 }
  0x97   : > { %877 = vmatprep.mubr.msk.bf16.mxu0 %vm1179_vm0, %v1178_v0  ;;  %850 = vmatpush3.bf16.msra.mxu1 %v970_v11 }
  0x98   : > { %851 = vmatprep.subr.bf16.mxu1 %v1178_v0  ;;  %862 = vmatpush3.bf16.msra.mxu0 %v974_v15 }
  0x99   : > { %863 = vmatprep.subr.bf16.mxu0 %v1178_v0 }
  0x9b   : > { %852 = vmatpush3.bf16.msra.mxu1 %v971_v12 }
  0x9c   : > { %853 = vmatprep.subr.bf16.mxu1 %v1178_v0  ;;  %864 = vmatpush3.bf16.msra.mxu0 %v975_v16 }
  0x9d   : > { %865 = vmatprep.subr.bf16.mxu0 %v1178_v0 }
  0x9f   : > { %854 = vmatpush3.bf16.msra.mxu1 %v972_v13 }
  0xa0   : > { %855 = vmatprep.subr.bf16.mxu1 %v1178_v0  ;;  %866 = vmatpush3.bf16.msra.mxu0 %v976_v17 }
  0xa1   : > { %867 = vmatprep.subr.bf16.mxu0 %v1178_v0 }
  0xa3   : > { %856 = vmatpush3.bf16.msra.mxu1 %v973_v14 }
  0xa4   : > { %868 = vmatpush3.bf16.msra.mxu0 %v977_v18 }
  0xa5   : > { %869 = vmatprep.subr.bf16.mxu0 %v1178_v0 }
  0xa8   : > { %870 = vmatpush3.bf16.msra.mxu0 %v978_v19 }
  0xa9   : > { %871 = vmatprep.subr.bf16.mxu0 %v1178_v0 }
  0xac   : > { %872 = vmatpush3.bf16.msra.mxu0 %v979_v20 }
  0xad   : > { %873 = vmatprep.subr.bf16.mxu0 %v1178_v0 }
  0xb0   : > { %874 = vmatpush3.bf16.msra.mxu0 %v980_v21 }
  0xb1   : > { %875 = vmatprep.subr.bf16.mxu0 %v1178_v0 }
  0xb4   : > { %876 = vmatpush3.bf16.msra.mxu0 %v981_v30 }
 0x169   : > { %v418_v23 = vpop.f32.mrb[0].mxu0 }
 0x16a   : > { %v419_v24 = vadd.f32 %v778_v22, %v418_v23  ;;  %v839_v25 = vpop.f32.mrb[1].mxu0 }
 0x16b   : > { %v421_v26 = vpop.f32.mrb[2].mxu0 }
 0x16c   : > { %v424_v27 = vmax.f32 %v419_v24, 0.0  ;;  %v840_v28 = vpop.f32.mrb[3].mxu0 }
 0x16e   : > { %v425_v29 = vpack.c.bf16 %v424_v27, %v424_v27 }
 0x170   : > { %858 = vmatmul.mubr.bf16.vlgmr.msra.gmra.mrb[0].mxu1 %v425_v29 }
 0x243   : > { %v531_v32 = vpop.f32.mrb[0].mxu1 }
 0x244   : > { %v532_v33 = vadd.f32 %v784_v31, %v531_v32  ;;  %v859_v34 = vpop.f32.mrb[1].mxu1 }
 0x245   : > { %v534_v35 = vpop.f32.mrb[2].mxu1 }
 0x246   : > { %v537_v36 = vpack.c.bf16 %v532_v33, %v532_v33  ;;  %v860_v37 = vpop.f32.mrb[3].mxu1 }
 0x248   : > { %878 = vmatmul.mubr.bf16.vlgmr.msra.gmra.mrb[4].mxu0 %v537_v36 }
 0x31b   : > { %v643_v39 = vpop.f32.mrb[4].mxu0 }
 0x31c   : > { %v644_v40 = vadd.f32 %v793_v38, %v643_v39  ;;  %v879_v41 = vpop.f32.mrb[5].mxu0 }
 0x31d   : > { %v646_v42 = vpop.f32.mrb[6].mxu0 }
 0x31e   : > { %v649_v43 = vpack.c.bf16 %v644_v40, %v644_v40  ;;  %v880_v44 = vpop.f32.mrb[7].mxu0 }
 0x320   : > { %650 = vst [vmem:[%s337_s15] sm:$0xf] %v649_v43 }
 0x321   : > { %1109 = shalt.err (!%p1106_p4)
}
 0x322   : > { %s1110_s8 = scalar_lea.hbm %s1476_s21, 64  ;;  %s1114_s14 = scalar_lea.hbm %s1527_s7, 128 }
 0x323   : > { %p1111_p0 = scmp.ne.s32.totalorder %s1476_s21, %s1110_s8  ;;  %p1115_p11 = scmp.lt.u32.totalorder %s1476_s21, %s1527_s7 }
 0x324   : > { %p1116_p13 = scmp.lt.u32.totalorder %s1114_s14, %s1110_s8  ;;  %p1118_p10 = scmp.lt.u32.totalorder %s1110_s8, %s1476_s21 }
 0x325   : > { %p1112_p9 = pnand %p1111_p0, %p1375_p5 }
 0x326   : > { %p1117_p6 = por %p1116_p13, %p1115_p11 }
 0x327   : > { %p1113_p8 = pneg %p1112_p9 }
 0x328   : > { %p1119_p3 = por %p1118_p10, %p1117_p6 }
 0x32a   : > { %p1120_p7 = pnand %p1119_p3, %p1113_p8 }
 0x32c   : > { %1123 = shalt.err (!%p1120_p7)
}
 0x32d   : > { %895 = dma.vmem_to_hbm [thread:$0]  (%p1375_p5), %s1478_s29, 64, %s1476_s21, %s652_s16  }
 0x32e PF: > { %s1547_s15 = sld [smem:[#allocation15_spill]]  ;;  %s677_s12 = sand.u32 1, %s1158_s24  }
 0x32f   : > { %p1549_p1 = scmp.ge.s32.totalorder %s1170_s27, 2  ;;  %s678_s17 = scalar_lea.sflag [#allocation4], %s677_s12 }
 0x334   : > { %p1548_p12 = scmp.ne.s32.totalorder %s1547_s15, 0 }
 0x336   : > { %p912_p2 = pnand %p1549_p1, %p1548_p12 }
 0x338   : > { %1153 = dma.done.wait (!%p912_p2), %s678_s17, 64  }
 0x339   : > { %1155 = vsyncadd (!%p912_p2), %s678_s17, 4294967232  ;;  %p22_p4 = scmp.ge.s32.totalorder %s1361_s22, 4   ;;  %s1550_s24 = smov %s1162_s25 }
 0x33a   : > { %s1551_s25 = smov %s1166_s26  ;;  %s1552_s26 = smov %s1371_s18 }
 0x33b   : > { %s1553_s27 = smov %s1361_s22  ;;  %24 = sbr.rel (!%p22_p4) target bundleno = 7 (0x7), region = 105 }
 0x342   :  { %683 = vsyncpa [#allocation3], 1 }
 0x343   :  { %685 = vsyncpa [#allocation3 + $0x1], 1 }
 0x344   :  { %686 = vsyncpa [#allocation6], 1 }
 0x345   :  { %687 = vsyncpa [#allocation9], 1 }
 0x346   :  { %688 = vsyncpa [#allocation4], 1 }
 0x347   :  { %690 = vsyncpa [#allocation4 + $0x1], 1 }

</bundles_post_ra>
